<compile_context>
chip_gen: v5e
topology: v5e:2x2
jax: 0.10.0
libtpu: 0.0.40
codegen_flags: <defaults>
</compile_context>

<pallas_src>
import jax
import jax.numpy as jnp
from jax.experimental import pallas as pl
from jax.experimental.pallas import tpu as pltpu

LANE = 128  # lane-padded hidden width (64 -> 128 zero-padded, math no-op)


def _round_up(n, m):
    return ((n + m - 1) // m) * m


def qnetwork_kernel(x_ref, w1_ref, b1_ref, w2_ref, b2_ref, w3_ref, b3_ref, o_ref):
    # One batch tile entirely in VMEM: fc1 -> relu -> fc2 -> relu -> fc3.
    # x arrives in its original f32; casting to the weights' compute dtype here
    # (VPU) avoids a separate wrapper-side XLA convert pass over HBM.
    x = x_ref[...].astype(w1_ref.dtype)
    h1 = jnp.dot(x, w1_ref[...], preferred_element_type=jnp.float32) + b1_ref[...]
    h1 = jnp.maximum(h1, 0.0)
    h2 = jnp.dot(h1.astype(w2_ref.dtype), w2_ref[...],
                 preferred_element_type=jnp.float32) + b2_ref[...]
    h2 = jnp.maximum(h2, 0.0)
    # Final layer keeps its true (narrow) output width -> tiny HBM writeback.
    o_ref[...] = (jnp.dot(h2.astype(w3_ref.dtype), w3_ref[...],
                          preferred_element_type=jnp.float32)
                  + b3_ref[...]).astype(o_ref.dtype)


def _pick_batch_tile(B, tile_b, align):
    """Largest practical batch tile (amortizes per-step pipeline overhead),
    aligned to `align` sublanes, but split so mid/large batches always give a
    grid of >= 2 tiles (keeps both v7x TensorCores busy; no-op on v5e/v6e)."""
    full = _round_up(B, align)
    tb = min(_round_up(tile_b, align), full)
    if B >= 1024 and pl.cdiv(B, tb) < 2:
        tb = _round_up(pl.cdiv(full, 2), align)
    return tb


def qnetwork_forward(x, params_c, *, tile_b=4096):
    """x: (B, state_size) f32, unpadded and uncast.
    params_c: output of prepare_params (lane-padded, weights in compute dtype).
    Returns (B, action_size) f32."""
    w1, b1 = params_c["w1"], params_c["b1"]
    w2, b2 = params_c["w2"], params_c["b2"]
    w3, b3 = params_c["w3"], params_c["b3"]

    B, S = x.shape
    A = w3.shape[1]

    # Sub-32-bit operands pack two rows per sublane -> align batch tile to 16.
    align = 8 if jnp.dtype(w1.dtype).itemsize >= 4 else 16
    TB = _pick_batch_tile(B, tile_b, align)
    grid = (pl.cdiv(B, TB),)  # ragged last tile: reads clipped, writes clipped

    def resident(shape):  # weights/biases: DMA'd once, VMEM-resident every tile
        return pl.BlockSpec(shape, lambda i, _s=len(shape): (0,) * _s)

    return pl.pallas_call(
        qnetwork_kernel,
        out_shape=jax.ShapeDtypeStruct((B, A), jnp.float32),
        grid=grid,
        in_specs=[
            pl.BlockSpec((TB, S), lambda i: (i, 0)),
            resident(w1.shape), resident(b1.shape),
            resident(w2.shape), resident(b2.shape),
            resident(w3.shape), resident(b3.shape),
        ],
        out_specs=pl.BlockSpec((TB, A), lambda i: (i, 0)),
        compiler_params=pltpu.CompilerParams(
            # Batch axis shards across TensorCores on v7x; no-op on v5e/v6e.
            dimension_semantics=("parallel",),
            # Explicit scoped-VMEM limit so larger tiles never trip the
            # 16/32 MiB defaults silently; well under every chip's physical VMEM.
            vmem_limit_bytes=48 * 1024 * 1024,
        ),
    )(x, w1, b1, w2, b2, w3, b3)


def init_params(key, state_size, action_size, hidden=64):
    """Mimics PyTorch nn.Linear default init: U(-1/sqrt(fan_in), 1/sqrt(fan_in)).
    Weights stored (in_features, out_features) so the kernel computes x @ W + b."""
    def linear(k, fan_in, fan_out):
        kw, kb = jax.random.split(k)
        bound = 1.0 / jnp.sqrt(fan_in)
        w = jax.random.uniform(kw, (fan_in, fan_out), jnp.float32, -bound, bound)
        b = jax.random.uniform(kb, (1, fan_out), jnp.float32, -bound, bound)
        return w, b

    k1, k2, k3 = jax.random.split(key, 3)
    w1, b1 = linear(k1, state_size, hidden)
    w2, b2 = linear(k2, hidden, hidden)
    w3, b3 = linear(k3, hidden, action_size)
    return {"w1": w1, "b1": b1, "w2": w2, "b2": b2, "w3": w3, "b3": b3}


def prepare_params(p, compute_dtype=jnp.float32):
    """One-time prep: zero-pad hidden dims to 128 lanes (math no-op: padded
    hidden units are ReLU(0)=0 and multiply zero rows of the next weight) and
    pre-cast weights to the compute dtype so no per-call convert ops launch.
    Biases stay f32 (they add into the f32 MXU accumulator).  The final layer
    keeps its true output width so the kernel writes only action_size lanes.
    TODO(synk): optionally pad state_size to 128 at data-prep time for a fully
    lane-dense first matmul (free in HBM bytes, small MXU-side win)."""
    def padw(w, rows, cols):
        return jnp.pad(w, ((0, rows - w.shape[0]), (0, cols - w.shape[1])))

    def padb(b, cols):
        return jnp.pad(b, ((0, 0), (0, cols - b.shape[1])))

    S = p["w1"].shape[0]
    A = p["w3"].shape[1]
    return {
        "w1": padw(p["w1"], S, LANE).astype(compute_dtype),
        "b1": padb(p["b1"], LANE),
        "w2": padw(p["w2"], LANE, LANE).astype(compute_dtype),
        "b2": padb(p["b2"], LANE),
        "w3": padw(p["w3"], LANE, A).astype(compute_dtype),
        "b3": p["b3"],
    }


def reference_forward(x, p):
    h1 = jnp.maximum(x @ p["w1"] + p["b1"], 0.0)
    h2 = jnp.maximum(h1 @ p["w2"] + p["b2"], 0.0)
    return h2 @ p["w3"] + p["b3"]


if __name__ == "__main__":
    key = jax.random.PRNGKey(0)
    k_param, k_x, k_xb = jax.random.split(key, 3)

    batch, state_size, action_size = 2, 8, 4
    params = init_params(k_param, state_size, action_size)
    x = jax.random.normal(k_x, (batch, state_size), jnp.float32)
    ref = reference_forward(x, params)

    # f32 compute path: bit-compatible with the PyTorch module's math.
    params_f32 = prepare_params(params, jnp.float32)
    out_f32 = qnetwork_forward(x, params_f32)
    jax.block_until_ready(out_f32)
    assert out_f32.shape == (batch, action_size)
    assert jnp.allclose(out_f32, ref, atol=1e-5, rtol=1e-5)

    # bf16-operand path (MXU-native on v5e/v6e/v7x); f32 accumulation/bias/ReLU.
    params_bf16 = prepare_params(params, jnp.bfloat16)
    out_bf16 = qnetwork_forward(x, params_bf16)
    jax.block_until_ready(out_bf16)
    assert out_bf16.shape == (batch, action_size)
    assert jnp.allclose(out_bf16, ref, atol=5e-2, rtol=5e-2)

    # Multi-tile + ragged-last-tile path (grid >= 2, B not a tile multiple).
    xb = jax.random.normal(k_xb, (1100, state_size), jnp.float32)
    refb = reference_forward(xb, params)
    outb = qnetwork_forward(xb, params_f32)
    jax.block_until_ready(outb)
    assert outb.shape == (1100, action_size)
    assert jnp.allclose(outb, refb, atol=1e-5, rtol=1e-5)

    print("KERNEL_OK")
</pallas_src>

<mosaic_0001>
module attributes {stable_mosaic.version = 11 : i64} {
  func.func @qnetwork_kernel(%arg0: i32, %arg1: memref<8x8xf32, #tpu.memory_space<vmem>>, %arg2: memref<8x128xf32, #tpu.memory_space<vmem>>, %arg3: memref<1x128xf32, #tpu.memory_space<vmem>>, %arg4: memref<128x128xf32, #tpu.memory_space<vmem>>, %arg5: memref<1x128xf32, #tpu.memory_space<vmem>>, %arg6: memref<128x4xf32, #tpu.memory_space<vmem>>, %arg7: memref<1x4xf32, #tpu.memory_space<vmem>>, %arg8: memref<8x4xf32, #tpu.memory_space<vmem>>) attributes {dimension_semantics = [#tpu.dimension_semantics<parallel>], iteration_bounds = array<i64: 1>, scalar_prefetch = 0 : i64, scratch_operands = 0 : i64, tpu.core_type = #tpu.core_type<tc>, window_params = [{transform_indices = @transform_0, window_bounds = array<i64: 8, 8>}, {pipeline_mode = #tpu.pipeline_mode<synchronous>, transform_indices = @transform_1, window_bounds = array<i64: 8, 128>}, {pipeline_mode = #tpu.pipeline_mode<synchronous>, transform_indices = @transform_2, window_bounds = array<i64: 1, 128>}, {pipeline_mode = #tpu.pipeline_mode<synchronous>, transform_indices = @transform_3, window_bounds = array<i64: 128, 128>}, {pipeline_mode = #tpu.pipeline_mode<synchronous>, transform_indices = @transform_4, window_bounds = array<i64: 1, 128>}, {pipeline_mode = #tpu.pipeline_mode<synchronous>, transform_indices = @transform_5, window_bounds = array<i64: 128, 4>}, {pipeline_mode = #tpu.pipeline_mode<synchronous>, transform_indices = @transform_6, window_bounds = array<i64: 1, 4>}, {transform_indices = @transform_7, window_bounds = array<i64: 8, 4>}]} {
    %c0 = arith.constant 0 : index
    %c0_0 = arith.constant 0 : index
    %0 = vector.load %arg1[%c0, %c0_0] : memref<8x8xf32, #tpu.memory_space<vmem>>, vector<8x8xf32>
    %c0_1 = arith.constant 0 : index
    %c0_2 = arith.constant 0 : index
    %1 = vector.load %arg2[%c0_1, %c0_2] : memref<8x128xf32, #tpu.memory_space<vmem>>, vector<8x128xf32>
    %cst = arith.constant dense<0.000000e+00> : vector<8x128xf32>
    %2 = tpu.matmul %0, %1, %cst {dimension_numbers = #tpu.dot_dimension_numbers<[1], [0], [0], [1], [0, 0, 1, 1], [], []>} : vector<8x8xf32>, vector<8x128xf32>, vector<8x128xf32> -> vector<8x128xf32>
    %c0_3 = arith.constant 0 : index
    %c0_4 = arith.constant 0 : index
    %3 = vector.load %arg3[%c0_3, %c0_4] : memref<1x128xf32, #tpu.memory_space<vmem>>, vector<1x128xf32>
    %4 = vector.broadcast %3 : vector<1x128xf32> to vector<8x128xf32>
    %5 = arith.addf %2, %4 : vector<8x128xf32>
    %cst_5 = arith.constant 0.000000e+00 : f32
    %6 = vector.broadcast %cst_5 : f32 to vector<8x128xf32>
    %7 = arith.maximumf %5, %6 : vector<8x128xf32>
    %c0_6 = arith.constant 0 : index
    %c0_7 = arith.constant 0 : index
    %8 = vector.load %arg4[%c0_6, %c0_7] : memref<128x128xf32, #tpu.memory_space<vmem>>, vector<128x128xf32>
    %cst_8 = arith.constant dense<0.000000e+00> : vector<8x128xf32>
    %9 = tpu.matmul %7, %8, %cst_8 {dimension_numbers = #tpu.dot_dimension_numbers<[1], [0], [0], [1], [0, 0, 1, 1], [], []>} : vector<8x128xf32>, vector<128x128xf32>, vector<8x128xf32> -> vector<8x128xf32>
    %c0_9 = arith.constant 0 : index
    %c0_10 = arith.constant 0 : index
    %10 = vector.load %arg5[%c0_9, %c0_10] : memref<1x128xf32, #tpu.memory_space<vmem>>, vector<1x128xf32>
    %11 = vector.broadcast %10 : vector<1x128xf32> to vector<8x128xf32>
    %12 = arith.addf %9, %11 : vector<8x128xf32>
    %cst_11 = arith.constant 0.000000e+00 : f32
    %13 = vector.broadcast %cst_11 : f32 to vector<8x128xf32>
    %14 = arith.maximumf %12, %13 : vector<8x128xf32>
    %c0_12 = arith.constant 0 : index
    %c0_13 = arith.constant 0 : index
    %15 = vector.load %arg6[%c0_12, %c0_13] : memref<128x4xf32, #tpu.memory_space<vmem>>, vector<128x4xf32>
    %cst_14 = arith.constant dense<0.000000e+00> : vector<8x4xf32>
    %16 = tpu.matmul %14, %15, %cst_14 {dimension_numbers = #tpu.dot_dimension_numbers<[1], [0], [0], [1], [0, 0, 1, 1], [], []>} : vector<8x128xf32>, vector<128x4xf32>, vector<8x4xf32> -> vector<8x4xf32>
    %c0_15 = arith.constant 0 : index
    %c0_16 = arith.constant 0 : index
    %17 = vector.load %arg7[%c0_15, %c0_16] : memref<1x4xf32, #tpu.memory_space<vmem>>, vector<1x4xf32>
    %18 = vector.broadcast %17 : vector<1x4xf32> to vector<8x4xf32>
    %19 = arith.addf %16, %18 : vector<8x4xf32>
    %c0_17 = arith.constant 0 : index
    %c0_18 = arith.constant 0 : index
    %20 = vector.load %arg8[%c0_17, %c0_18] : memref<8x4xf32, #tpu.memory_space<vmem>>, vector<8x4xf32>
    tpu.vector_store %arg8[%c0_17, %c0_18], %19 {strides = array<i32>} : memref<8x4xf32, #tpu.memory_space<vmem>>, vector<8x4xf32>,
    return
  }
  func.func @transform_0(%arg0: i32) -> (i32, i32) {
    %c0_i32 = arith.constant 0 : i32
    %c0_i32_0 = arith.constant 0 : i32
    return %arg0, %c0_i32 : i32, i32
  }
  func.func @transform_1(%arg0: i32) -> (i32, i32) {
    %c0_i32 = arith.constant 0 : i32
    %c0_i32_0 = arith.constant 0 : i32
    %c0_i32_1 = arith.constant 0 : i32
    return %c0_i32, %c0_i32_0 : i32, i32
  }
  func.func @transform_2(%arg0: i32) -> (i32, i32) {
    %c0_i32 = arith.constant 0 : i32
    %c0_i32_0 = arith.constant 0 : i32
    %c0_i32_1 = arith.constant 0 : i32
    return %c0_i32, %c0_i32_0 : i32, i32
  }
  func.func @transform_3(%arg0: i32) -> (i32, i32) {
    %c0_i32 = arith.constant 0 : i32
    %c0_i32_0 = arith.constant 0 : i32
    %c0_i32_1 = arith.constant 0 : i32
    return %c0_i32, %c0_i32_0 : i32, i32
  }
  func.func @transform_4(%arg0: i32) -> (i32, i32) {
    %c0_i32 = arith.constant 0 : i32
    %c0_i32_0 = arith.constant 0 : i32
    %c0_i32_1 = arith.constant 0 : i32
    return %c0_i32, %c0_i32_0 : i32, i32
  }
  func.func @transform_5(%arg0: i32) -> (i32, i32) {
    %c0_i32 = arith.constant 0 : i32
    %c0_i32_0 = arith.constant 0 : i32
    %c0_i32_1 = arith.constant 0 : i32
    return %c0_i32, %c0_i32_0 : i32, i32
  }
  func.func @transform_6(%arg0: i32) -> (i32, i32) {
    %c0_i32 = arith.constant 0 : i32
    %c0_i32_0 = arith.constant 0 : i32
    %c0_i32_1 = arith.constant 0 : i32
    return %c0_i32, %c0_i32_0 : i32, i32
  }
  func.func @transform_7(%arg0: i32) -> (i32, i32) {
    %c0_i32 = arith.constant 0 : i32
    %c0_i32_0 = arith.constant 0 : i32
    return %arg0, %c0_i32 : i32, i32
  }
}

</mosaic_0001>

<bundles_post_ra>
// kernel: tpu_custom_call.1
= control target key start
LH: loop header
LB: loop body
LE: loop exit
PB: predicated region body
PF: predicated region fallthrough
CT: control target
= control target key end

     0   :  { %12 = vsyncpa [#allocation3], 0  ;;  %s392_s0 = inlined_call_operand.vmem [shape: f32[2,8], index: 0, kind: input, shape index: {}]   ;;  %s393_s1 = inlined_call_operand.hbm [shape: f32[8,128], index: 1, kind: input, shape index: {}]   ;;  %s394_s2 = inlined_call_operand.vmem [shape: f32[1,128], index: 2, kind: input, shape index: {}]   ;;  %s395_s3 = inlined_call_operand.vmem [shape: f32[128,128], index: 3, kind: input, shape index: {}]   ;;  %s396_s4 = inlined_call_operand.vmem [shape: f32[1,128], index: 4, kind: input, shape index: {}]   ;;  %s397_s5 = inlined_call_operand.vmem [shape: f32[128,4], index: 5, kind: input, shape index: {}]   ;;  %s398_s6 = inlined_call_operand.vmem [shape: f32[1,4], index: 6, kind: input, shape index: {}]   ;;  %s399_s7 = inlined_call_operand.hbm [shape: f32[2,4], index: 7, kind: output, shape index: {}]  }
   0x1   :  { %13 = vsyncpa [#allocation4], 0  ;;  %s21_s26 = sshll.u32 %s393_s1, 4  ;;  %s234_s27 = smov [#allocation2]   ;;  %s22_s26 = int_to_ptr.hbm [resolvable:$true] %s21_s26 }
   0x2   :  { %s23_s28 = sshll.u32 %s234_s27, 4  ;;  %s24_s28 = int_to_ptr.vmem [resolvable:$true] %s23_s28 }
   0x3   :  { %26 = dma.hbm_to_vmem [thread:$0]  %s22_s26, 128, %s24_s28, [#allocation3]  }
   0x4   :  { %230 = dma.done.wait [#allocation3], 128  }
   0x5   :  { %231 = vsyncadd [#allocation3], 4294967168  ;;  %vm47_vm0 = vcmask 64512   ;;  %v42_v0 = vld [vmem:[#allocation2] sm:$0xff]  ;;  %v87_v2 = vld [vmem:[%s395_s3 + $0x78] sm:$0xff]  ;;  %vm153_vm1 = vcmask 31744  }
   0x6   :  { %v41_v1 = vld [vmem:[%s392_s0] sm:$0xff]  ;;  %66 = vmatpush.msra.mxu0 %v42_v0  ;;  %92 = vmatpush.msra.mxu1 %v87_v2  ;;  %v86_v3 = vld [vmem:[%s395_s3 + $0x70] sm:$0xff]  ;;  %v85_v4 = vld [vmem:[%s395_s3 + $0x68] sm:$0xff] }
   0x7   :  { %174 = vmatmul.msk.f32.vlgmr.msra.gmra.mxu0 %vm47_vm0, %v41_v1  ;;  %v84_v5 = vld [vmem:[%s395_s3 + $0x60] sm:$0xff]  ;;  %v83_v6 = vld [vmem:[%s395_s3 + $0x58] sm:$0xff]  ;;  %v82_v7 = vld [vmem:[%s395_s3 + $0x50] sm:$0xff] }
   0x8   :  { %93 = vmatpush.msra.mxu1 %v86_v3  ;;  %v81_v8 = vld [vmem:[%s395_s3 + $0x48] sm:$0xff]  ;;  %v80_v9 = vld [vmem:[%s395_s3 + $0x40] sm:$0xff]  ;;  %v79_v10 = vld [vmem:[%s395_s3 + $0x38] sm:$0xff] }
   0x9   :  { %v78_v11 = vld [vmem:[%s395_s3 + $0x30] sm:$0xff]  ;;  %v77_v12 = vld [vmem:[%s395_s3 + $0x28] sm:$0xff]  ;;  %v76_v13 = vld [vmem:[%s395_s3 + $0x20] sm:$0xff] }
   0xa   :  { %94 = vmatpush.msra.mxu1 %v85_v4  ;;  %v75_v14 = vld [vmem:[%s395_s3 + $0x18] sm:$0xff]  ;;  %v74_v15 = vld [vmem:[%s395_s3 + $0x10] sm:$0xff]  ;;  %v73_v16 = vld [vmem:[%s395_s3 + $0x8] sm:$0xff] }
   0xb   :  { %v72_v17 = vld [vmem:[%s395_s3] sm:$0xff]  ;;  %v128_v18 = vld [vmem:[%s397_s5 + $0x78] sm:$0xff]  ;;  %v127_v19 = vld [vmem:[%s397_s5 + $0x70] sm:$0xff] }
   0xc   :  { %95 = vmatpush.msra.mxu1 %v84_v5  ;;  %133 = vmatpush.msra.mxu2 %v128_v18  ;;  %v126_v20 = vld [vmem:[%s397_s5 + $0x68] sm:$0xff]  ;;  %v125_v21 = vld [vmem:[%s397_s5 + $0x60] sm:$0xff]  ;;  %v124_v22 = vld [vmem:[%s397_s5 + $0x58] sm:$0xff] }
   0xd   :  { %v123_v23 = vld [vmem:[%s397_s5 + $0x50] sm:$0xff]  ;;  %v122_v24 = vld [vmem:[%s397_s5 + $0x48] sm:$0xff]  ;;  %v121_v25 = vld [vmem:[%s397_s5 + $0x40] sm:$0xff] }
   0xe   :  { %96 = vmatpush.msra.mxu1 %v83_v6  ;;  %134 = vmatpush.msra.mxu2 %v127_v19  ;;  %v120_v26 = vld [vmem:[%s397_s5 + $0x38] sm:$0xff]  ;;  %v119_v27 = vld [vmem:[%s397_s5 + $0x30] sm:$0xff]  ;;  %v118_v28 = vld [vmem:[%s397_s5 + $0x28] sm:$0xff] }
   0xf   :  { %v117_v29 = vld [vmem:[%s397_s5 + $0x20] sm:$0xff]  ;;  %v116_v30 = vld [vmem:[%s397_s5 + $0x18] sm:$0xff]  ;;  %v115_v35 = vld [vmem:[%s397_s5 + $0x10] sm:$0xff] }
  0x10   :  { %97 = vmatpush.msra.mxu1 %v82_v7  ;;  %135 = vmatpush.msra.mxu2 %v126_v20  ;;  %v179_v31 = vld [vmem:[%s394_s2] ss:$0 sm:$0xff]  ;;  %v114_v36 = vld [vmem:[%s397_s5 + $0x8] sm:$0xff] }
  0x11   :  { %v113_v37 = vld [vmem:[%s397_s5] sm:$0xff] }
  0x12   :  { %98 = vmatpush.msra.mxu1 %v81_v8  ;;  %136 = vmatpush.msra.mxu2 %v125_v21  ;;  %v180_v38 = vld [vmem:[%s396_s4] ss:$0 sm:$0xff] }
  0x13   :  { %v181_v42 = vld [vmem:[%s398_s6] ss:$0 sm:$0xff] }
  0x14   :  { %99 = vmatpush.msra.mxu1 %v80_v9  ;;  %137 = vmatpush.msra.mxu2 %v124_v22 }
  0x16   :  { %100 = vmatpush.msra.mxu1 %v79_v10  ;;  %138 = vmatpush.msra.mxu2 %v123_v23 }
  0x18   :  { %101 = vmatpush.msra.mxu1 %v78_v11  ;;  %139 = vmatpush.msra.mxu2 %v122_v24 }
  0x1a   :  { %102 = vmatpush.msra.mxu1 %v77_v12  ;;  %140 = vmatpush.msra.mxu2 %v121_v25 }
  0x1c   :  { %103 = vmatpush.msra.mxu1 %v76_v13  ;;  %141 = vmatpush.msra.mxu2 %v120_v26 }
  0x1e   :  { %104 = vmatpush.msra.mxu1 %v75_v14  ;;  %142 = vmatpush.msra.mxu2 %v119_v27 }
  0x20   :  { %105 = vmatpush.msra.mxu1 %v74_v15  ;;  %143 = vmatpush.msra.mxu2 %v118_v28 }
  0x22   :  { %106 = vmatpush.msra.mxu1 %v73_v16  ;;  %144 = vmatpush.msra.mxu2 %v117_v29 }
  0x24   :  { %107 = vmatpush.msra.mxu1 %v72_v17  ;;  %145 = vmatpush.msra.mxu2 %v116_v30 }
  0x26   :  { %146 = vmatpush.msra.mxu2 %v115_v35 }
  0x28   :  { %147 = vmatpush.msra.mxu2 %v114_v36 }
  0x2a   :  { %148 = vmatpush.msra.mxu2 %v113_v37 }
  0x84   :  { %v68_v32 = vpop.f32.mrf.mxu0 }
  0x85   :  { %v69_v33 = vadd.f32 %v179_v31, %v68_v32 }
  0x87   :  { %v71_v34 = vmax.f32 %v69_v33, 0.0 }
  0x89   :  { %108 = vmatmul.f32.vlgmr.msra.gmra.mxu1 %v71_v34 }
 0x106   :  { %v109_v39 = vpop.f32.mrf.mxu1 }
 0x107   :  { %v110_v40 = vadd.f32 %v180_v38, %v109_v39 }
 0x109   :  { %v112_v41 = vmax.f32 %v110_v40, 0.0 }
 0x10b   :  { %149 = vmatmul.f32.vlgmr.msra.gmra.mxu2 %v112_v41 }
 0x18e   :  { %v150_v43 = vpop.f32.mrf.mxu2 }
 0x18f   :  { %v151_v44 = vadd.f32 %v181_v42, %v150_v43 }
 0x191   :  { %154 = vst.msk [vmem:[#allocation5] sm:$0xff] %vm153_vm1, %v151_v44 }
 0x192   :  { %158 = vsyncadd [#allocation4], 96  ;;  %s161_s24 = sshll.u32 %s399_s7, 4  ;;  %s235_s25 = smov [#allocation5]   ;;  %s162_s24 = int_to_ptr.hbm [resolvable:$true] %s161_s24 }
 0x193   :  { %s159_s26 = sshll.u32 %s235_s25, 4  ;;  %s236_s4 = smov 32   ;;  %s160_s26 = int_to_ptr.vmem [resolvable:$true] %s159_s26 }
 0x194   :  { %s237_s27 = smov 2  }
 0x195   :  { %167 = dma.vmem_to_hbm [thread:$0]  %s160_s26, 32, %s162_s24, [#allocation4], %s236_s4, %s236_s4, %s237_s27  }
 0x196   :  { %232 = dma.done.wait [#allocation4], 128  }
 0x197   :  { %233 = vsyncadd [#allocation4], 4294967168 }
 0x198   :  { %172 = vsyncpa [#allocation3], 1 }
 0x199   :  { %173 = vsyncpa [#allocation4], 1 }

</bundles_post_ra>
